<compile_context>
chip_gen: v6e
topology: v6e:2x2x1
jax: 0.10.0
libtpu: 0.0.40
codegen_flags: <defaults>
</compile_context>

<pallas_src>
import jax
import jax.numpy as jnp
import numpy as np
from jax.experimental import pallas as pl
from jax.experimental.pallas import tpu as pltpu


def _norm_kernel(mean_ref, inv_std_ref, x_ref, o_ref):
    # mean_ref / inv_std_ref are f32 shape-(1,) scalars in SMEM.
    m = mean_ref[0]
    inv = inv_std_ref[0]
    xf = x_ref[...].astype(jnp.float32)
    o_ref[...] = ((xf - m) * inv).astype(o_ref.dtype)


_LANE_CHOICES = (4096, 2048, 1024, 512, 256, 128)
_MIB = 1024 * 1024


def _round_up(n, m):
    return ((n + m - 1) // m) * m


def _cdiv(a, b):
    return -(-a // b)


def _vmem_budget():
    """(target_tile_bytes, vmem_limit_bytes) for the current TPU generation."""
    try:
        cap = int(pltpu.get_tpu_info().vmem_capacity_bytes)
    except Exception:
        cap = 64 * _MIB  # conservative: assume v7x-sized VMEM
    if cap >= 128 * _MIB:
        # v5e / v6e: 16 MiB tiles -> ~64 MiB live (in+out, double-buffered).
        return 16 * _MIB, 96 * _MIB
    # v7x (64 MiB VMEM): 8 MiB tiles -> ~32 MiB live.
    return 8 * _MIB, 56 * _MIB


def _plan_layout(total, itemsize, target_tile_bytes):
    """Pick (lanes, tile_rows, num_tiles, padded_rows) for a lane-dense view."""
    # Widest lane dim such that at least one full (8, lanes) tile exists.
    lanes = 128
    for cand in _LANE_CHOICES:
        if 8 * cand <= total:
            lanes = cand
            break

    rows = _cdiv(total, lanes)

    # Row-tile sized toward the byte budget (multiple of 8, >= 8).
    tile_rows_max = max(8, (target_tile_bytes // (lanes * itemsize)) // 8 * 8)

    num_tiles = _cdiv(rows, tile_rows_max)
    # Give v7x's two TensorCores work for anything bigger than ~1 MiB
    # (harmless on single-TC v5e/v6e: one extra tiny grid step).
    if num_tiles == 1 and total * itemsize > 1 * _MIB:
        num_tiles = 2

    tile_rows = _round_up(_cdiv(rows, num_tiles), 8)
    padded_rows = tile_rows * num_tiles
    return lanes, tile_rows, num_tiles, padded_rows


def normalization(x, mean, std):
    """Pallas TPU implementation of Normalization.forward: (x - mean) / std."""
    orig_shape = x.shape
    total = int(np.prod(orig_shape)) if orig_shape else 1

    # PyTorch promotes against the float buffers: keep at least float32 out.
    out_dtype = jnp.promote_types(x.dtype, jnp.float32)

    # Statistics kept in f32; divide replaced by reciprocal-mul (<=1 ulp diff).
    mean32 = jnp.asarray(mean, jnp.float32).reshape((1,))
    inv_std32 = (jnp.float32(1.0) / jnp.asarray(std, jnp.float32)).reshape((1,))

    if total == 0:
        return jnp.zeros(orig_shape, out_dtype)

    itemsize = max(jnp.dtype(x.dtype).itemsize, jnp.dtype(out_dtype).itemsize)
    target_tile_bytes, vmem_limit_bytes = _vmem_budget()
    lanes, tile_rows, num_tiles, padded_rows = _plan_layout(
        total, itemsize, target_tile_bytes
    )

    padded_total = padded_rows * lanes
    x_flat = jnp.reshape(x, (total,))
    if padded_total != total:
        x_flat = jnp.pad(x_flat, (0, padded_total - total))
    x_view = jnp.reshape(x_flat, (padded_rows, lanes))

    data_spec = pl.BlockSpec((tile_rows, lanes), lambda i: (i, 0))

    y = pl.pallas_call(
        _norm_kernel,
        out_shape=jax.ShapeDtypeStruct((padded_rows, lanes), out_dtype),
        grid_spec=pltpu.PrefetchScalarGridSpec(
            num_scalar_prefetch=0,
            grid=(num_tiles,),
            in_specs=[
                pl.BlockSpec(memory_space=pltpu.MemorySpace.SMEM),  # mean (f32)
                pl.BlockSpec(memory_space=pltpu.MemorySpace.SMEM),  # 1/std (f32)
                data_spec,                                          # x tile
            ],
            out_specs=data_spec,
        ),
        compiler_params=pltpu.CompilerParams(
            dimension_semantics=("parallel",),
            vmem_limit_bytes=vmem_limit_bytes,
        ),
    )(mean32, inv_std32, x_view)

    y_flat = jnp.reshape(y, (padded_total,))
    if padded_total != total:
        y_flat = y_flat[:total]
    return jnp.reshape(y_flat, orig_shape)


if __name__ == "__main__":
    key = jax.random.PRNGKey(0)

    # Small synthetic "audio" batch: 2 clips of 2048 samples each.
    B, L = 2, 2048
    x = jax.random.normal(key, (B, L), dtype=jnp.float32) * 3.0 + 1.5

    # Dataset statistics (glue, plain JAX) -- mimics the mean/std computed over
    # the flattened training split in the original script.
    mean = jnp.mean(x)
    std = jnp.std(x)

    y = jax.block_until_ready(normalization(x, mean, std))
    y_ref = (x - mean) / std
    np.testing.assert_allclose(np.asarray(y), np.asarray(y_ref), rtol=1e-5, atol=1e-6)

    # Lane-dense, padding-free path (rows already a multiple of 8).
    B2, L2 = 8, 4096
    x2 = jax.random.normal(jax.random.PRNGKey(1), (B2, L2), dtype=jnp.float32) * 2.0 - 0.5
    y2 = jax.block_until_ready(normalization(x2, mean, std))
    y2_ref = (x2 - mean) / std
    np.testing.assert_allclose(np.asarray(y2), np.asarray(y2_ref), rtol=1e-5, atol=1e-6)

    # Odd shape exercising the wrapper pad + slice path (no 128 factor).
    B3, L3 = 3, 1000
    x3 = jax.random.normal(jax.random.PRNGKey(2), (B3, L3), dtype=jnp.float32) * 5.0 + 0.25
    y3 = jax.block_until_ready(normalization(x3, mean, std))
    y3_ref = (x3 - mean) / std
    np.testing.assert_allclose(np.asarray(y3), np.asarray(y3_ref), rtol=1e-5, atol=1e-6)

    print("KERNEL_OK")
</pallas_src>

<mosaic_0001>
module attributes {stable_mosaic.version = 11 : i64} {
  func.func @_norm_kernel(%arg0: i32, %arg1: memref<1xf32, #tpu.memory_space<smem>>, %arg2: memref<1xf32, #tpu.memory_space<smem>>, %arg3: memref<8x512xf32, #tpu.memory_space<vmem>>, %arg4: memref<8x512xf32, #tpu.memory_space<vmem>>) attributes {dimension_semantics = [#tpu.dimension_semantics<parallel>], iteration_bounds = array<i64: 1>, scalar_prefetch = 0 : i64, scratch_operands = 0 : i64, tpu.core_type = #tpu.core_type<tc>, window_params = [{transform_indices = @transform_0, window_bounds = array<i64: 1>}, {transform_indices = @transform_1, window_bounds = array<i64: 1>}, {transform_indices = @transform_2, window_bounds = array<i64: 8, 512>}, {transform_indices = @transform_3, window_bounds = array<i64: 8, 512>}]} {
    %c0 = arith.constant 0 : index
    %0 = memref.load %arg1[%c0] : memref<1xf32, #tpu.memory_space<smem>>
    %c0_0 = arith.constant 0 : index
    %1 = memref.load %arg2[%c0_0] : memref<1xf32, #tpu.memory_space<smem>>
    %c0_1 = arith.constant 0 : index
    %c0_2 = arith.constant 0 : index
    %2 = vector.load %arg3[%c0_1, %c0_2] : memref<8x512xf32, #tpu.memory_space<vmem>>, vector<8x512xf32>
    %3 = vector.broadcast %0 : f32 to vector<8x512xf32>
    %4 = arith.subf %2, %3 : vector<8x512xf32>
    %5 = vector.broadcast %1 : f32 to vector<8x512xf32>
    %6 = arith.mulf %4, %5 : vector<8x512xf32>
    %c0_3 = arith.constant 0 : index
    %c0_4 = arith.constant 0 : index
    %7 = vector.load %arg4[%c0_3, %c0_4] : memref<8x512xf32, #tpu.memory_space<vmem>>, vector<8x512xf32>
    tpu.vector_store %arg4[%c0_3, %c0_4], %6 {strides = array<i32>} : memref<8x512xf32, #tpu.memory_space<vmem>>, vector<8x512xf32>,
    return
  }
  func.func @transform_0(%arg0: i32) -> i32 {
    %c0_i32 = arith.constant 0 : i32
    %c0_i32_0 = arith.constant 0 : i32
    return %c0_i32 : i32
  }
  func.func @transform_1(%arg0: i32) -> i32 {
    %c0_i32 = arith.constant 0 : i32
    %c0_i32_0 = arith.constant 0 : i32
    return %c0_i32 : i32
  }
  func.func @transform_2(%arg0: i32) -> (i32, i32) {
    %c0_i32 = arith.constant 0 : i32
    %c0_i32_0 = arith.constant 0 : i32
    return %arg0, %c0_i32 : i32, i32
  }
  func.func @transform_3(%arg0: i32) -> (i32, i32) {
    %c0_i32 = arith.constant 0 : i32
    %c0_i32_0 = arith.constant 0 : i32
    return %arg0, %c0_i32 : i32, i32
  }
}

</mosaic_0001>

<bundles_post_ra>
// kernel: tpu_custom_call.1
= control target key start
LH: loop header
LB: loop body
LE: loop exit
PB: predicated region body
PF: predicated region fallthrough
CT: control target
= control target key end

     0   :  { %10 = vsyncpa [#allocation5], 0  ;;  %s144_s0 = inlined_call_operand.<no memory space> [shape: f32[1], index: 0, kind: input, shape index: {}]   ;;  %s145_s1 = inlined_call_operand.<no memory space> [shape: f32[1], index: 1, kind: input, shape index: {}]   ;;  %s146_s2 = inlined_call_operand.hbm [shape: f32[8,512], index: 2, kind: input, shape index: {}]   ;;  %s147_s3 = inlined_call_operand.hbm [shape: f32[8,512], index: 3, kind: output, shape index: {}]  }
   0x1   :  { %11 = vsyncpa [#allocation6], 0  ;;  %s110_s12 = smov [#allocation4]  }
   0x2   :  { %s22_s13 = sshll.u32 %s110_s12, 4  ;;  %s23_s13 = int_to_ptr.vmem [resolvable:$true] %s22_s13 }
   0x3   :  { %s74_s14 = scalar_lea.vmem %s23_s13, 512  ;;  %p79_p1 = scmp.lt.s32.totalorder %s23_s13, %s23_s13 }
   0x4   :  { %p75_p0 = scmp.ne.s32.totalorder %s23_s13, %s74_s14  ;;  %p80_p2 = scmp.lt.s32.totalorder %s74_s14, %s74_s14 }
   0x6   :  { %p81_p3 = por %p80_p2, %p79_p1 }
   0x8   :  { %p82_p4 = pnand %p81_p3, %p75_p0 }
   0xa   :  { %85 = shalt.err (!%p82_p4)
}
   0xb   :  { %25 = dma.hbm_to_vmem [thread:$0]  %s146_s2, 512, %s23_s13, [#allocation5]  }
   0xc   :  { %106 = dma.done.wait [#allocation5], 512  }
   0xd   :  { %107 = vsyncadd [#allocation5], 4294966784  ;;  %v35_v0 = vstv %s144_s0  ;;  %v31_v1 = vld [vmem:[#allocation4] sm:$0xff]  ;;  %v40_v2 = vstv %s145_s1  ;;  %v32_v3 = vld [vmem:[#allocation4 + $0x8] sm:$0xff]  ;;  %s111_s21 = smov [#allocation7]  }
   0xe   :  { %v33_v4 = vld [vmem:[#allocation4 + $0x10] sm:$0xff]  ;;  %v36_v5 = vsub.f32 %v31_v1, %v35_v0  ;;  %v37_v6 = vsub.f32 %v32_v3, %v35_v0  ;;  %v34_v8 = vld [vmem:[#allocation4 + $0x18] sm:$0xff]  ;;  %s55_s22 = sshll.u32 %s111_s21, 4  ;;  %s56_s22 = int_to_ptr.vmem [resolvable:$true] %s55_s22 }
   0xf   :  { %v38_v7 = vsub.f32 %v33_v4, %v35_v0  ;;  %v39_v9 = vsub.f32 %v34_v8, %v35_v0  ;;  %s86_s0 = scalar_lea.vmem %s56_s22, 512  ;;  %p91_p6 = scmp.lt.s32.totalorder %s56_s22, %s56_s22 }
  0x10   :  { %v41_v10 = vmul.f32 %v40_v2, %v36_v5  ;;  %v42_v11 = vmul.f32 %v40_v2, %v37_v6  ;;  %p87_p5 = scmp.ne.s32.totalorder %s56_s22, %s86_s0  ;;  %p92_p7 = scmp.lt.s32.totalorder %s86_s0, %s86_s0 }
  0x11   :  { %v43_v12 = vmul.f32 %v40_v2, %v38_v7  ;;  %v44_v13 = vmul.f32 %v40_v2, %v39_v9 }
  0x12   :  { %45 = vst [vmem:[#allocation7] sm:$0xff] %v41_v10  ;;  %46 = vst [vmem:[#allocation7 + $0x8] sm:$0xff] %v42_v11  ;;  %p93_p8 = por %p92_p7, %p91_p6 }
  0x13   :  { %47 = vst [vmem:[#allocation7 + $0x10] sm:$0xff] %v43_v12  ;;  %48 = vst [vmem:[#allocation7 + $0x18] sm:$0xff] %v44_v13 }
  0x14   :  { %p94_p9 = pnand %p93_p8, %p87_p5 }
  0x16   :  { %97 = shalt.err (!%p94_p9)
}
  0x17   :  { %58 = dma.vmem_to_hbm [thread:$0]  %s56_s22, 512, %s147_s3, [#allocation6]  }
  0x18   :  { %108 = dma.done.wait [#allocation6], 512  }
  0x19   :  { %109 = vsyncadd [#allocation6], 4294966784 }
  0x1a   :  { %62 = vsyncpa [#allocation5], 1 }
  0x1b   :  { %63 = vsyncpa [#allocation6], 1 }

</bundles_post_ra>
